<compile_context>
chip_gen: v7x
topology: tpu7x:2x2x1
jax: 0.10.0
libtpu: 0.0.40
codegen_flags: <defaults>
</compile_context>

<pallas_src>
import functools
import math

import jax
import jax.numpy as jnp
from jax.experimental import pallas as pl
from jax.experimental.pallas import tpu as pltpu

_LN_EPS = 1e-5
_INV_SQRT2 = 1.0 / math.sqrt(2.0)


def _round_up(x, m):
    return ((x + m - 1) // m) * m


def _vmem_cap_bytes():
    """~3/4 of physical per-core VMEM (48 MiB on v7x, 96 MiB on v5e/v6e)."""
    phys = 128 * 1024 * 1024
    try:
        info = pltpu.get_tpu_info()
        phys = int(getattr(info, "vmem_capacity_bytes", phys))
    except Exception:
        pass
    return min(96 * 1024 * 1024, (phys * 3) // 4)


# ---------------------------------------------------------------------------
# Attention block:
#   x -> x + softmax( (LN(x)Wq * scale)(LN(x)Wk)^T ) LN(x)Wv @ Wo + bo
# One grid step per batch element; whole sequence resident in VMEM (ViT seq
# lengths are small).
# ---------------------------------------------------------------------------
def _attn_block_kernel(x_ref, g_ref, b_ref, wqkv_ref, wo_ref, bo_ref, o_ref,
                       *, heads, dim_head, scale):
    x = x_ref[0].astype(jnp.float32)                         # (N, dim)

    # PreNorm (LayerNorm over the feature dim, PyTorch eps=1e-5).
    mu = jnp.mean(x, axis=-1, keepdims=True)
    var = jnp.mean(jnp.square(x - mu), axis=-1, keepdims=True)
    xn = (x - mu) * jax.lax.rsqrt(var + _LN_EPS)
    xn = xn * g_ref[...].astype(jnp.float32) + b_ref[...].astype(jnp.float32)

    # Fused QKV projection (bias-free, as in the PyTorch module).
    qkv = jnp.dot(xn.astype(wqkv_ref.dtype), wqkv_ref[...],
                  preferred_element_type=jnp.float32)        # (N, 3*inner)
    inner = heads * dim_head

    head_outs = []
    for h in range(heads):
        # Scale q (N, dim_head) instead of the (N, N) logits tensor.
        q = qkv[:, h * dim_head:(h + 1) * dim_head] * scale
        k = qkv[:, inner + h * dim_head:inner + (h + 1) * dim_head]
        v = qkv[:, 2 * inner + h * dim_head:2 * inner + (h + 1) * dim_head]
        # q @ k^T without materializing a transpose (contract last dims).
        dots = jax.lax.dot_general(q, k, (((1,), (1,)), ((), ())),
                                   preferred_element_type=jnp.float32)
        dots = dots - jnp.max(dots, axis=-1, keepdims=True)
        e = jnp.exp(dots)
        attn = e * pl.reciprocal(jnp.sum(e, axis=-1, keepdims=True), approx=True)
        head_outs.append(jnp.dot(attn, v,
                                 preferred_element_type=jnp.float32))  # (N, dh)

    # Single full-depth output projection:  (N, inner) @ (inner, dim).
    o_all = jnp.concatenate(head_outs, axis=-1)              # (N, inner)
    y = (x + bo_ref[...].astype(jnp.float32)
         + jnp.dot(o_all.astype(wo_ref.dtype), wo_ref[...],
                   preferred_element_type=jnp.float32))
    o_ref[0] = y.astype(o_ref.dtype)


def attention_block(x, gamma, beta, wqkv, wo, bo, *, heads, dim_head):
    """x: (B, N, dim) -> (B, N, dim), includes PreNorm and the residual add."""
    B, N, dim = x.shape
    inner = heads * dim_head
    assert wqkv.shape == (dim, 3 * inner) and wo.shape == (inner, dim)
    # NOTE: matches the PyTorch module, which scales by dim ** -0.5 (not dim_head).
    scale = dim ** (-0.5)

    itemsize = jnp.dtype(x.dtype).itemsize
    flops = (2 * B * N * dim * 3 * inner            # QKV projection
             + 4 * B * heads * N * N * dim_head     # QK^T and AV
             + 2 * B * N * inner * dim)             # output projection
    bytes_accessed = itemsize * (2 * B * N * dim + dim * 3 * inner
                                 + inner * dim + 3 * dim)
    # Per-step blocks (double-buffered) + f32 kernel temporaries, with headroom.
    vmem_need = (2 * itemsize * (2 * N * dim + dim * 3 * inner + inner * dim + 5 * dim)
                 + 4 * (3 * N * dim + 4 * N * inner + 2 * N * N))
    vmem_limit = max(32 * 1024 * 1024, min(_vmem_cap_bytes(), 2 * vmem_need))

    kernel = functools.partial(_attn_block_kernel, heads=heads,
                               dim_head=dim_head, scale=scale)
    return pl.pallas_call(
        kernel,
        out_shape=jax.ShapeDtypeStruct((B, N, dim), x.dtype),
        grid_spec=pltpu.PrefetchScalarGridSpec(
            num_scalar_prefetch=0,
            grid=(B,),
            in_specs=[
                pl.BlockSpec((1, N, dim), lambda b: (b, 0, 0)),       # x
                pl.BlockSpec((1, dim), lambda b: (0, 0)),             # LN gamma
                pl.BlockSpec((1, dim), lambda b: (0, 0)),             # LN beta
                pl.BlockSpec((dim, 3 * inner), lambda b: (0, 0)),     # Wqkv
                pl.BlockSpec((inner, dim), lambda b: (0, 0)),         # Wo
                pl.BlockSpec((1, dim), lambda b: (0, 0)),             # bo
            ],
            out_specs=pl.BlockSpec((1, N, dim), lambda b: (b, 0, 0)),
        ),
        compiler_params=pltpu.CompilerParams(
            dimension_semantics=("parallel",),
            vmem_limit_bytes=int(vmem_limit)),
        cost_estimate=pl.CostEstimate(
            flops=flops, transcendentals=B * heads * N * N,
            bytes_accessed=bytes_accessed),
    )(x, gamma.reshape(1, dim), beta.reshape(1, dim), wqkv, wo, bo.reshape(1, dim))


# ---------------------------------------------------------------------------
# FeedForward block:  x -> x + ( GELU( LN(x) @ W1 + b1 ) @ W2 + b2 )
# Grid = (rows // tm, hidden // th); hidden is a reduction axis accumulated in
# an f32 VMEM scratch.  LN(x) is computed once per row tile (kh == 0) and
# cached in a second scratch; b2 + residual are applied only in the epilogue.
# ---------------------------------------------------------------------------
def _ffn_block_kernel(x_ref, g_ref, b_ref, w1_ref, b1_ref, w2_ref, b2_ref, o_ref,
                      xn_ref, acc_ref):
    kh = pl.program_id(1)

    @pl.when(kh == 0)
    def _():
        x = x_ref[...].astype(jnp.float32)
        mu = jnp.mean(x, axis=-1, keepdims=True)
        var = jnp.mean(jnp.square(x - mu), axis=-1, keepdims=True)
        xn = (x - mu) * jax.lax.rsqrt(var + _LN_EPS)
        xn_ref[...] = xn * g_ref[...].astype(jnp.float32) + b_ref[...].astype(jnp.float32)
        acc_ref[...] = jnp.zeros_like(acc_ref)

    # First matmul on one hidden tile; bias + exact (erf) GELU in f32.
    h = jnp.dot(xn_ref[...].astype(w1_ref.dtype), w1_ref[...],
                preferred_element_type=jnp.float32)
    h = h + b1_ref[...].astype(jnp.float32)
    h = 0.5 * h * (1.0 + jax.lax.erf(h * _INV_SQRT2))

    # Second matmul: accumulate partial sums over hidden tiles in f32.
    acc_ref[...] += jnp.dot(h.astype(w2_ref.dtype), w2_ref[...],
                            preferred_element_type=jnp.float32)

    @pl.when(kh == pl.num_programs(1) - 1)
    def _():
        y = acc_ref[...] + b2_ref[...].astype(jnp.float32) + x_ref[...].astype(jnp.float32)
        o_ref[...] = y.astype(o_ref.dtype)


def feed_forward_block(x, gamma, beta, w1, b1, w2, b2, *, tm=None, th=None):
    """x: (B, N, dim) -> (B, N, dim), includes PreNorm and the residual add."""
    B, N, dim = x.shape
    hidden = w1.shape[1]
    M = B * N
    itemsize = jnp.dtype(x.dtype).itemsize
    cap = _vmem_cap_bytes()

    # ---- Row tile: prefer a divisor of M (no pad / slice HBM round-trips). ---
    if tm is None:
        tm_max = 512 if cap >= 64 * 1024 * 1024 else 256   # smaller on v7x
    else:
        tm_max = max(8, tm)
    if M <= tm_max:
        tm = M
    else:
        tm = 0
        for cand in range(min(tm_max, M), 7, -1):
            if M % cand == 0 and cand % 8 == 0:
                tm = cand
                break
        if tm == 0:  # no suitable divisor: fall back to padding
            tm = _round_up(max(8, min(tm_max, M)), 8)
    M_pad = _round_up(M, tm)

    # ---- Hidden (reduction) tile: make weights VMEM-resident when cheap. -----
    if th is None:
        w_bytes = 2 * dim * hidden * itemsize               # W1 + W2
        th = hidden if w_bytes <= cap // 4 else 512
    th = min(th, hidden)
    if hidden % th != 0 or (th != hidden and th % 128 != 0):
        th = hidden

    x2d = x.reshape(M, dim)
    if M_pad != M:
        x2d = jnp.pad(x2d, ((0, M_pad - M), (0, 0)))

    grid = (M_pad // tm, hidden // th)

    flops = 2 * 2 * M_pad * dim * hidden
    bytes_accessed = itemsize * (2 * M_pad * dim + 2 * dim * hidden + hidden + 3 * dim)
    # Double-buffered per-step tiles + f32 scratches + f32 hidden temp, headroom.
    vmem_need = (2 * itemsize * (2 * tm * dim + dim * th + th * dim + th + 3 * dim)
                 + 2 * 4 * tm * dim + 4 * tm * th)
    vmem_limit = max(32 * 1024 * 1024, min(cap, 2 * vmem_need))

    out = pl.pallas_call(
        _ffn_block_kernel,
        out_shape=jax.ShapeDtypeStruct((M_pad, dim), x.dtype),
        grid_spec=pltpu.PrefetchScalarGridSpec(
            num_scalar_prefetch=0,
            grid=grid,
            in_specs=[
                pl.BlockSpec((tm, dim), lambda i, k: (i, 0)),      # x rows (+ residual)
                pl.BlockSpec((1, dim), lambda i, k: (0, 0)),       # LN gamma
                pl.BlockSpec((1, dim), lambda i, k: (0, 0)),       # LN beta
                pl.BlockSpec((dim, th), lambda i, k: (0, k)),      # W1 hidden tile
                pl.BlockSpec((1, th), lambda i, k: (0, k)),        # b1 hidden tile
                pl.BlockSpec((th, dim), lambda i, k: (k, 0)),      # W2 hidden tile
                pl.BlockSpec((1, dim), lambda i, k: (0, 0)),       # b2
            ],
            out_specs=pl.BlockSpec((tm, dim), lambda i, k: (i, 0)),
            scratch_shapes=[
                pltpu.VMEM((tm, dim), jnp.float32),   # cached LN(x) tile
                pltpu.VMEM((tm, dim), jnp.float32),   # f32 accumulator
            ],
        ),
        compiler_params=pltpu.CompilerParams(
            dimension_semantics=("parallel", "arbitrary"),
            vmem_limit_bytes=int(vmem_limit)),
        cost_estimate=pl.CostEstimate(
            flops=flops, transcendentals=M_pad * hidden,
            bytes_accessed=bytes_accessed),
    )(x2d, gamma.reshape(1, dim), beta.reshape(1, dim),
      w1, b1.reshape(1, hidden), w2, b2.reshape(1, dim))

    if M_pad != M:
        out = out[:M]
    return out.reshape(B, N, dim)


# ---------------------------------------------------------------------------
# Full Transformer forward (depth layers of attn-block then ffn-block).
# ---------------------------------------------------------------------------
def transformer_forward(x, layers, *, heads, dim_head, mask=None):
    # TODO(synk): attention mask path (mask is not None) is not implemented.
    assert mask is None, "mask path not implemented"
    for p in layers:
        x = attention_block(x, p["ln1_g"], p["ln1_b"], p["wqkv"], p["wo"], p["bo"],
                            heads=heads, dim_head=dim_head)
        x = feed_forward_block(x, p["ln2_g"], p["ln2_b"], p["w1"], p["b1"],
                               p["w2"], p["b2"])
    return x


# ---------------------------------------------------------------------------
# Pure-JAX reference.
# ---------------------------------------------------------------------------
def _ref_layernorm(x, g, b):
    mu = jnp.mean(x, axis=-1, keepdims=True)
    var = jnp.mean(jnp.square(x - mu), axis=-1, keepdims=True)
    return (x - mu) * jax.lax.rsqrt(var + _LN_EPS) * g + b


def reference_transformer(x, layers, *, heads, dim_head):
    B, N, dim = x.shape
    inner = heads * dim_head
    scale = dim ** (-0.5)
    for p in layers:
        xn = _ref_layernorm(x, p["ln1_g"], p["ln1_b"])
        qkv = xn @ p["wqkv"]
        q, k, v = jnp.split(qkv, 3, axis=-1)
        to_heads = lambda t: t.reshape(B, N, heads, dim_head).transpose(0, 2, 1, 3)
        q, k, v = map(to_heads, (q, k, v))
        dots = jnp.einsum("bhid,bhjd->bhij", q, k) * scale
        attn = jax.nn.softmax(dots, axis=-1)
        o = jnp.einsum("bhij,bhjd->bhid", attn, v)
        o = o.transpose(0, 2, 1, 3).reshape(B, N, inner)
        x = x + (o @ p["wo"] + p["bo"])

        xn = _ref_layernorm(x, p["ln2_g"], p["ln2_b"])
        h = xn @ p["w1"] + p["b1"]
        h = 0.5 * h * (1.0 + jax.lax.erf(h * _INV_SQRT2))
        x = x + (h @ p["w2"] + p["b2"])
    return x


if __name__ == "__main__":
    B, N = 2, 8
    dim, depth, heads, dim_head, mlp_dim = 32, 2, 4, 8, 64
    inner = heads * dim_head

    key = jax.random.PRNGKey(0)
    kx, key = jax.random.split(key)
    x = jax.random.normal(kx, (B, N, dim), dtype=jnp.float32)

    layers = []
    for _ in range(depth):
        ks = jax.random.split(key, 12)
        key = ks[0]
        bnd_qkv = 1.0 / math.sqrt(dim)
        bnd_o = 1.0 / math.sqrt(inner)
        bnd_1 = 1.0 / math.sqrt(dim)
        bnd_2 = 1.0 / math.sqrt(mlp_dim)
        layers.append(dict(
            ln1_g=1.0 + 0.1 * jax.random.normal(ks[1], (dim,), jnp.float32),
            ln1_b=0.1 * jax.random.normal(ks[2], (dim,), jnp.float32),
            wqkv=jax.random.uniform(ks[3], (dim, 3 * inner), jnp.float32, -bnd_qkv, bnd_qkv),
            wo=jax.random.uniform(ks[4], (inner, dim), jnp.float32, -bnd_o, bnd_o),
            bo=jax.random.uniform(ks[5], (dim,), jnp.float32, -bnd_o, bnd_o),
            ln2_g=1.0 + 0.1 * jax.random.normal(ks[6], (dim,), jnp.float32),
            ln2_b=0.1 * jax.random.normal(ks[7], (dim,), jnp.float32),
            w1=jax.random.uniform(ks[8], (dim, mlp_dim), jnp.float32, -bnd_1, bnd_1),
            b1=jax.random.uniform(ks[9], (mlp_dim,), jnp.float32, -bnd_1, bnd_1),
            w2=jax.random.uniform(ks[10], (mlp_dim, dim), jnp.float32, -bnd_2, bnd_2),
            b2=jax.random.uniform(ks[11], (dim,), jnp.float32, -bnd_2, bnd_2),
        ))

    out = transformer_forward(x, layers, heads=heads, dim_head=dim_head)
    out = jax.block_until_ready(out)

    ref = reference_transformer(x, layers, heads=heads, dim_head=dim_head)
    assert out.shape == (B, N, dim)
    # Slightly looser tolerance than f32-exact: softmax uses the EUP
    # approximate reciprocal (pl.reciprocal(approx=True)).
    assert jnp.allclose(out, ref, atol=2e-3, rtol=2e-3), \
        float(jnp.max(jnp.abs(out - ref)))

    print("KERNEL_OK")
</pallas_src>

<mosaic_0001>
module attributes {stable_mosaic.version = 11 : i64} {
  func.func @_attn_block_kernel(%arg0: i32, %arg1: memref<1x8x32xf32, #tpu.memory_space<vmem>>, %arg2: memref<1x32xf32, #tpu.memory_space<vmem>>, %arg3: memref<1x32xf32, #tpu.memory_space<vmem>>, %arg4: memref<32x96xf32, #tpu.memory_space<vmem>>, %arg5: memref<32x32xf32, #tpu.memory_space<vmem>>, %arg6: memref<1x32xf32, #tpu.memory_space<vmem>>, %arg7: memref<1x8x32xf32, #tpu.memory_space<vmem>>) attributes {dimension_semantics = [#tpu.dimension_semantics<parallel>], iteration_bounds = array<i64: 2>, scalar_prefetch = 0 : i64, scratch_operands = 0 : i64, tpu.core_type = #tpu.core_type<tc>, window_params = [{transform_indices = @transform_0, window_bounds = array<i64: 1, 8, 32>}, {pipeline_mode = #tpu.pipeline_mode<synchronous>, transform_indices = @transform_1, window_bounds = array<i64: 1, 32>}, {pipeline_mode = #tpu.pipeline_mode<synchronous>, transform_indices = @transform_2, window_bounds = array<i64: 1, 32>}, {pipeline_mode = #tpu.pipeline_mode<synchronous>, transform_indices = @transform_3, window_bounds = array<i64: 32, 96>}, {pipeline_mode = #tpu.pipeline_mode<synchronous>, transform_indices = @transform_4, window_bounds = array<i64: 32, 32>}, {pipeline_mode = #tpu.pipeline_mode<synchronous>, transform_indices = @transform_5, window_bounds = array<i64: 1, 32>}, {transform_indices = @transform_6, window_bounds = array<i64: 1, 8, 32>}]} {
    %c0 = arith.constant 0 : index
    %c0_0 = arith.constant 0 : index
    %c0_1 = arith.constant 0 : index
    %0 = vector.load %arg1[%c0, %c0_0, %c0_1] : memref<1x8x32xf32, #tpu.memory_space<vmem>>, vector<1x8x32xf32>
    %1 = vector.shape_cast %0 : vector<1x8x32xf32> to vector<8x32xf32>
    %cst = arith.constant dense<0.000000e+00> : vector<8xf32>
    %2 = vector.multi_reduction <add>, %1, %cst [1] : vector<8x32xf32> to vector<8xf32>
    %3 = vector.shape_cast %2 : vector<8xf32> to vector<8x1xf32>
    %cst_2 = arith.constant 3.200000e+01 : f32
    %4 = vector.broadcast %cst_2 : f32 to vector<8x1xf32>
    %5 = arith.divf %3, %4 : vector<8x1xf32>
    %6 = vector.broadcast %5 : vector<8x1xf32> to vector<8x32xf32>
    %7 = arith.subf %1, %6 : vector<8x32xf32>
    %8 = arith.mulf %7, %7 : vector<8x32xf32>
    %cst_3 = arith.constant dense<0.000000e+00> : vector<8xf32>
    %9 = vector.multi_reduction <add>, %8, %cst_3 [1] : vector<8x32xf32> to vector<8xf32>
    %10 = vector.shape_cast %9 : vector<8xf32> to vector<8x1xf32>
    %cst_4 = arith.constant 3.200000e+01 : f32
    %11 = vector.broadcast %cst_4 : f32 to vector<8x1xf32>
    %12 = arith.divf %10, %11 : vector<8x1xf32>
    %13 = vector.broadcast %5 : vector<8x1xf32> to vector<8x32xf32>
    %14 = arith.subf %1, %13 : vector<8x32xf32>
    %cst_5 = arith.constant 9.99999974E-6 : f32
    %15 = vector.broadcast %cst_5 : f32 to vector<8x1xf32>
    %16 = arith.addf %12, %15 : vector<8x1xf32>
    %17 = math.rsqrt %16 : vector<8x1xf32>
    %18 = vector.broadcast %17 : vector<8x1xf32> to vector<8x32xf32>
    %19 = arith.mulf %14, %18 : vector<8x32xf32>
    %c0_6 = arith.constant 0 : index
    %c0_7 = arith.constant 0 : index
    %20 = vector.load %arg2[%c0_6, %c0_7] : memref<1x32xf32, #tpu.memory_space<vmem>>, vector<1x32xf32>
    %21 = vector.broadcast %20 : vector<1x32xf32> to vector<8x32xf32>
    %22 = arith.mulf %19, %21 : vector<8x32xf32>
    %c0_8 = arith.constant 0 : index
    %c0_9 = arith.constant 0 : index
    %23 = vector.load %arg3[%c0_8, %c0_9] : memref<1x32xf32, #tpu.memory_space<vmem>>, vector<1x32xf32>
    %24 = vector.broadcast %23 : vector<1x32xf32> to vector<8x32xf32>
    %25 = arith.addf %22, %24 : vector<8x32xf32>
    %c0_10 = arith.constant 0 : index
    %c0_11 = arith.constant 0 : index
    %26 = vector.load %arg4[%c0_10, %c0_11] : memref<32x96xf32, #tpu.memory_space<vmem>>, vector<32x96xf32>
    %cst_12 = arith.constant dense<0.000000e+00> : vector<8x96xf32>
    %27 = tpu.matmul %25, %26, %cst_12 {dimension_numbers = #tpu.dot_dimension_numbers<[1], [0], [0], [1], [0, 0, 1, 1], [], []>} : vector<8x32xf32>, vector<32x96xf32>, vector<8x96xf32> -> vector<8x96xf32>
    %28 = vector.extract_strided_slice %27 {offsets = [0, 0], sizes = [8, 8], strides = [1, 1]} : vector<8x96xf32> to vector<8x8xf32>
    %cst_13 = arith.constant 0.176776692 : f32
    %29 = vector.broadcast %cst_13 : f32 to vector<8x8xf32>
    %30 = arith.mulf %28, %29 : vector<8x8xf32>
    %31 = vector.extract_strided_slice %27 {offsets = [0, 32], sizes = [8, 8], strides = [1, 1]} : vector<8x96xf32> to vector<8x8xf32>
    %32 = vector.extract_strided_slice %27 {offsets = [0, 64], sizes = [8, 8], strides = [1, 1]} : vector<8x96xf32> to vector<8x8xf32>
    %cst_14 = arith.constant dense<0.000000e+00> : vector<8x8xf32>
    %33 = tpu.matmul %30, %31, %cst_14 {dimension_numbers = #tpu.dot_dimension_numbers<[1], [1], [0], [0], [0, 0, 1, 0], [], []>} : vector<8x8xf32>, vector<8x8xf32>, vector<8x8xf32> -> vector<8x8xf32>
    %cst_15 = arith.constant dense<0xFF800000> : vector<8xf32>
    %34 = vector.multi_reduction <maximumf>, %33, %cst_15 [1] : vector<8x8xf32> to vector<8xf32>
    %35 = vector.shape_cast %34 : vector<8xf32> to vector<8x1xf32>
    %36 = vector.broadcast %35 : vector<8x1xf32> to vector<8x8xf32>
    %37 = arith.subf %33, %36 : vector<8x8xf32>
    %38 = math.exp %37 : vector<8x8xf32>
    %cst_16 = arith.constant dense<0.000000e+00> : vector<8xf32>
    %39 = vector.multi_reduction <add>, %38, %cst_16 [1] : vector<8x8xf32> to vector<8xf32>
    %40 = vector.shape_cast %39 : vector<8xf32> to vector<8x1xf32>
    %41 = tpu.reciprocal %40 {approx = true} : vector<8x1xf32> -> vector<8x1xf32>
    %42 = vector.broadcast %41 : vector<8x1xf32> to vector<8x8xf32>
    %43 = arith.mulf %38, %42 : vector<8x8xf32>
    %cst_17 = arith.constant dense<0.000000e+00> : vector<8x8xf32>
    %44 = tpu.matmul %43, %32, %cst_17 {dimension_numbers = #tpu.dot_dimension_numbers<[1], [0], [0], [1], [0, 0, 1, 1], [], []>} : vector<8x8xf32>, vector<8x8xf32>, vector<8x8xf32> -> vector<8x8xf32>
    %45 = vector.extract_strided_slice %27 {offsets = [0, 8], sizes = [8, 8], strides = [1, 1]} : vector<8x96xf32> to vector<8x8xf32>
    %cst_18 = arith.constant 0.176776692 : f32
    %46 = vector.broadcast %cst_18 : f32 to vector<8x8xf32>
    %47 = arith.mulf %45, %46 : vector<8x8xf32>
    %48 = vector.extract_strided_slice %27 {offsets = [0, 40], sizes = [8, 8], strides = [1, 1]} : vector<8x96xf32> to vector<8x8xf32>
    %49 = vector.extract_strided_slice %27 {offsets = [0, 72], sizes = [8, 8], strides = [1, 1]} : vector<8x96xf32> to vector<8x8xf32>
    %cst_19 = arith.constant dense<0.000000e+00> : vector<8x8xf32>
    %50 = tpu.matmul %47, %48, %cst_19 {dimension_numbers = #tpu.dot_dimension_numbers<[1], [1], [0], [0], [0, 0, 1, 0], [], []>} : vector<8x8xf32>, vector<8x8xf32>, vector<8x8xf32> -> vector<8x8xf32>
    %cst_20 = arith.constant dense<0xFF800000> : vector<8xf32>
    %51 = vector.multi_reduction <maximumf>, %50, %cst_20 [1] : vector<8x8xf32> to vector<8xf32>
    %52 = vector.shape_cast %51 : vector<8xf32> to vector<8x1xf32>
    %53 = vector.broadcast %52 : vector<8x1xf32> to vector<8x8xf32>
    %54 = arith.subf %50, %53 : vector<8x8xf32>
    %55 = math.exp %54 : vector<8x8xf32>
    %cst_21 = arith.constant dense<0.000000e+00> : vector<8xf32>
    %56 = vector.multi_reduction <add>, %55, %cst_21 [1] : vector<8x8xf32> to vector<8xf32>
    %57 = vector.shape_cast %56 : vector<8xf32> to vector<8x1xf32>
    %58 = tpu.reciprocal %57 {approx = true} : vector<8x1xf32> -> vector<8x1xf32>
    %59 = vector.broadcast %58 : vector<8x1xf32> to vector<8x8xf32>
    %60 = arith.mulf %55, %59 : vector<8x8xf32>
    %cst_22 = arith.constant dense<0.000000e+00> : vector<8x8xf32>
    %61 = tpu.matmul %60, %49, %cst_22 {dimension_numbers = #tpu.dot_dimension_numbers<[1], [0], [0], [1], [0, 0, 1, 1], [], []>} : vector<8x8xf32>, vector<8x8xf32>, vector<8x8xf32> -> vector<8x8xf32>
    %62 = vector.extract_strided_slice %27 {offsets = [0, 16], sizes = [8, 8], strides = [1, 1]} : vector<8x96xf32> to vector<8x8xf32>
    %cst_23 = arith.constant 0.176776692 : f32
    %63 = vector.broadcast %cst_23 : f32 to vector<8x8xf32>
    %64 = arith.mulf %62, %63 : vector<8x8xf32>
    %65 = vector.extract_strided_slice %27 {offsets = [0, 48], sizes = [8, 8], strides = [1, 1]} : vector<8x96xf32> to vector<8x8xf32>
    %66 = vector.extract_strided_slice %27 {offsets = [0, 80], sizes = [8, 8], strides = [1, 1]} : vector<8x96xf32> to vector<8x8xf32>
    %cst_24 = arith.constant dense<0.000000e+00> : vector<8x8xf32>
    %67 = tpu.matmul %64, %65, %cst_24 {dimension_numbers = #tpu.dot_dimension_numbers<[1], [1], [0], [0], [0, 0, 1, 0], [], []>} : vector<8x8xf32>, vector<8x8xf32>, vector<8x8xf32> -> vector<8x8xf32>
    %cst_25 = arith.constant dense<0xFF800000> : vector<8xf32>
    %68 = vector.multi_reduction <maximumf>, %67, %cst_25 [1] : vector<8x8xf32> to vector<8xf32>
    %69 = vector.shape_cast %68 : vector<8xf32> to vector<8x1xf32>
    %70 = vector.broadcast %69 : vector<8x1xf32> to vector<8x8xf32>
    %71 = arith.subf %67, %70 : vector<8x8xf32>
    %72 = math.exp %71 : vector<8x8xf32>
    %cst_26 = arith.constant dense<0.000000e+00> : vector<8xf32>
    %73 = vector.multi_reduction <add>, %72, %cst_26 [1] : vector<8x8xf32> to vector<8xf32>
    %74 = vector.shape_cast %73 : vector<8xf32> to vector<8x1xf32>
    %75 = tpu.reciprocal %74 {approx = true} : vector<8x1xf32> -> vector<8x1xf32>
    %76 = vector.broadcast %75 : vector<8x1xf32> to vector<8x8xf32>
    %77 = arith.mulf %72, %76 : vector<8x8xf32>
    %cst_27 = arith.constant dense<0.000000e+00> : vector<8x8xf32>
    %78 = tpu.matmul %77, %66, %cst_27 {dimension_numbers = #tpu.dot_dimension_numbers<[1], [0], [0], [1], [0, 0, 1, 1], [], []>} : vector<8x8xf32>, vector<8x8xf32>, vector<8x8xf32> -> vector<8x8xf32>
    %79 = vector.extract_strided_slice %27 {offsets = [0, 24], sizes = [8, 8], strides = [1, 1]} : vector<8x96xf32> to vector<8x8xf32>
    %cst_28 = arith.constant 0.176776692 : f32
    %80 = vector.broadcast %cst_28 : f32 to vector<8x8xf32>
    %81 = arith.mulf %79, %80 : vector<8x8xf32>
    %82 = vector.extract_strided_slice %27 {offsets = [0, 56], sizes = [8, 8], strides = [1, 1]} : vector<8x96xf32> to vector<8x8xf32>
    %83 = vector.extract_strided_slice %27 {offsets = [0, 88], sizes = [8, 8], strides = [1, 1]} : vector<8x96xf32> to vector<8x8xf32>
    %cst_29 = arith.constant dense<0.000000e+00> : vector<8x8xf32>
    %84 = tpu.matmul %81, %82, %cst_29 {dimension_numbers = #tpu.dot_dimension_numbers<[1], [1], [0], [0], [0, 0, 1, 0], [], []>} : vector<8x8xf32>, vector<8x8xf32>, vector<8x8xf32> -> vector<8x8xf32>
    %cst_30 = arith.constant dense<0xFF800000> : vector<8xf32>
    %85 = vector.multi_reduction <maximumf>, %84, %cst_30 [1] : vector<8x8xf32> to vector<8xf32>
    %86 = vector.shape_cast %85 : vector<8xf32> to vector<8x1xf32>
    %87 = vector.broadcast %86 : vector<8x1xf32> to vector<8x8xf32>
    %88 = arith.subf %84, %87 : vector<8x8xf32>
    %89 = math.exp %88 : vector<8x8xf32>
    %cst_31 = arith.constant dense<0.000000e+00> : vector<8xf32>
    %90 = vector.multi_reduction <add>, %89, %cst_31 [1] : vector<8x8xf32> to vector<8xf32>
    %91 = vector.shape_cast %90 : vector<8xf32> to vector<8x1xf32>
    %92 = tpu.reciprocal %91 {approx = true} : vector<8x1xf32> -> vector<8x1xf32>
    %93 = vector.broadcast %92 : vector<8x1xf32> to vector<8x8xf32>
    %94 = arith.mulf %89, %93 : vector<8x8xf32>
    %cst_32 = arith.constant dense<0.000000e+00> : vector<8x8xf32>
    %95 = tpu.matmul %94, %83, %cst_32 {dimension_numbers = #tpu.dot_dimension_numbers<[1], [0], [0], [1], [0, 0, 1, 1], [], []>} : vector<8x8xf32>, vector<8x8xf32>, vector<8x8xf32> -> vector<8x8xf32>
    %96 = tpu.concatenate %44, %61, %78, %95 in 1 : vector<8x8xf32>, vector<8x8xf32>, vector<8x8xf32>, vector<8x8xf32> -> vector<8x32xf32>
    %c0_33 = arith.constant 0 : index
    %c0_34 = arith.constant 0 : index
    %97 = vector.load %arg6[%c0_33, %c0_34] : memref<1x32xf32, #tpu.memory_space<vmem>>, vector<1x32xf32>
    %98 = vector.broadcast %97 : vector<1x32xf32> to vector<8x32xf32>
    %99 = arith.addf %1, %98 : vector<8x32xf32>
    %c0_35 = arith.constant 0 : index
    %c0_36 = arith.constant 0 : index
    %100 = vector.load %arg5[%c0_35, %c0_36] : memref<32x32xf32, #tpu.memory_space<vmem>>, vector<32x32xf32>
    %cst_37 = arith.constant dense<0.000000e+00> : vector<8x32xf32>
    %101 = tpu.matmul %96, %100, %cst_37 {dimension_numbers = #tpu.dot_dimension_numbers<[1], [0], [0], [1], [0, 0, 1, 1], [], []>} : vector<8x32xf32>, vector<32x32xf32>, vector<8x32xf32> -> vector<8x32xf32>
    %102 = arith.addf %99, %101 : vector<8x32xf32>
    %c0_38 = arith.constant 0 : index
    %c0_39 = arith.constant 0 : index
    %c0_40 = arith.constant 0 : index
    %103 = vector.load %arg7[%c0_38, %c0_39, %c0_40] : memref<1x8x32xf32, #tpu.memory_space<vmem>>, vector<1x8x32xf32>
    %104 = vector.shape_cast %103 : vector<1x8x32xf32> to vector<8x32xf32>
    %105 = vector.shape_cast %102 : vector<8x32xf32> to vector<1x8x32xf32>
    tpu.vector_store %arg7[%c0_38, %c0_39, %c0_40], %105 {strides = array<i32>} : memref<1x8x32xf32, #tpu.memory_space<vmem>>, vector<1x8x32xf32>,
    return
  }
  func.func @transform_0(%arg0: i32) -> (i32, i32, i32) {
    %c0_i32 = arith.constant 0 : i32
    %c0_i32_0 = arith.constant 0 : i32
    %c0_i32_1 = arith.constant 0 : i32
    return %arg0, %c0_i32, %c0_i32_0 : i32, i32, i32
  }
  func.func @transform_1(%arg0: i32) -> (i32, i32) {
    %c0_i32 = arith.constant 0 : i32
    %c0_i32_0 = arith.constant 0 : i32
    %c0_i32_1 = arith.constant 0 : i32
    return %c0_i32, %c0_i32_0 : i32, i32
  }
  func.func @transform_2(%arg0: i32) -> (i32, i32) {
    %c0_i32 = arith.constant 0 : i32
    %c0_i32_0 = arith.constant 0 : i32
    %c0_i32_1 = arith.constant 0 : i32
    return %c0_i32, %c0_i32_0 : i32, i32
  }
  func.func @transform_3(%arg0: i32) -> (i32, i32) {
    %c0_i32 = arith.constant 0 : i32
    %c0_i32_0 = arith.constant 0 : i32
    %c0_i32_1 = arith.constant 0 : i32
    return %c0_i32, %c0_i32_0 : i32, i32
  }
  func.func @transform_4(%arg0: i32) -> (i32, i32) {
    %c0_i32 = arith.constant 0 : i32
    %c0_i32_0 = arith.constant 0 : i32
    %c0_i32_1 = arith.constant 0 : i32
    return %c0_i32, %c0_i32_0 : i32, i32
  }
  func.func @transform_5(%arg0: i32) -> (i32, i32) {
    %c0_i32 = arith.constant 0 : i32
    %c0_i32_0 = arith.constant 0 : i32
    %c0_i32_1 = arith.constant 0 : i32
    return %c0_i32, %c0_i32_0 : i32, i32
  }
  func.func @transform_6(%arg0: i32) -> (i32, i32, i32) {
    %c0_i32 = arith.constant 0 : i32
    %c0_i32_0 = arith.constant 0 : i32
    %c0_i32_1 = arith.constant 0 : i32
    return %arg0, %c0_i32, %c0_i32_0 : i32, i32, i32
  }
}

</mosaic_0001>

<bundles_post_ra>
// kernel: tpu_custom_call.1
= control target key start
LH: loop header
LB: loop body
LE: loop exit
PB: predicated region body
PF: predicated region fallthrough
CT: control target
= control target key end

     0   :  { %11 = vsyncpa [#allocation3], 0  ;;  %s2046_s0 = inlined_call_operand.hbm [shape: f32[2,8,32], index: 0, kind: input, shape index: {}]   ;;  %s2047_s1 = inlined_call_operand.vmem [shape: f32[1,32], index: 1, kind: input, shape index: {}]   ;;  %s2048_s2 = inlined_call_operand.vmem [shape: f32[1,32], index: 2, kind: input, shape index: {}]   ;;  %s2049_s3 = inlined_call_operand.hbm [shape: f32[32,96], index: 3, kind: input, shape index: {}]   ;;  %s2050_s4 = inlined_call_operand.hbm [shape: f32[32,32], index: 4, kind: input, shape index: {}]   ;;  %s2051_s5 = inlined_call_operand.vmem [shape: f32[1,32], index: 5, kind: input, shape index: {}]   ;;  %s2052_s6 = inlined_call_operand.hbm [shape: f32[2,8,32], index: 6, kind: output, shape index: {}]  }
   0x1   :  { %13 = vsyncpa [#allocation3 + $0x1], 0 }
   0x2   :  { %14 = vsyncpa [#allocation6], 0 }
   0x3   :  { %15 = vsyncpa [#allocation4], 0 }
   0x4   :  { %17 = vsyncpa [#allocation4 + $0x1], 0  ;;  %s1727_s21 = smov 0   ;;  %s1729_s22 = smov 0  }
   0x5   :  { %s1731_s23 = smov 0   ;;  %s1733_s24 = smov 0  }
   0x6 LB: > { %s1748_s25 = sadd.s32 4294967295, %s1667_s24   ;;  %s1274_s26 = sadd.s32 4294967294, %s1667_s24   ;;  %s1667_s24 = sphi %s1733_s24, %s2072_s24   ;;  %s1663_s23 = sphi %s1731_s23, %s2071_s23   ;;  %s1659_s22 = sphi %s1729_s22, %s2070_s22   ;;  %s1655_s21 = sphi %s1727_s21, %s2069_s21  }
   0x7   : > { %p43_p0 = scmp.ne.s32.totalorder %s1659_s22, %s1655_s21  ;;  %p2053_p1 = scmp.eq.s32.totalorder %s1748_s25, 0 }
   0x8   : > { %p178_p3 = scmp.eq.s32.totalorder %s1274_s26, 1  ;;  %p1275_p5 = scmp.ge.s32.totalorder %s1667_s24, 1 }
   0x9   : > { %p1757_p4 = por %p2053_p1, %p43_p0  ;;  %p185_p7 = scmp.lt.s32.totalorder %s1667_s24, 3 }
   0xa   : > { %p1762_p6 = por %p178_p3, %p43_p0  ;;  %s1669_s30 = smov [#allocation5]  }
   0xb   : > { %s2056_s27 = scalar_select %p1757_p4, 1, 0 }
   0xc   : > { %s2057_s28 = scalar_select %p1762_p6, 1, 0 }
   0xd   : > { %p1767_p8 = pnand %p1275_p5, %p185_p7  ;;  %s203_s7 = sshll.u32 %s1669_s30, 4  ;;  %s1771_s7 = int_to_ptr.vmem [resolvable:$true] %s203_s7 }
   0xe   : > { %s1670_s9 = smov [#allocation7]   ;;  %s1511_s13 = scalar_lea.hbm %s2049_s3, 512 }
   0xf   : > { %p1419_p9 = pneg %p1767_p8  ;;  %s216_s10 = sshll.u32 %s1670_s9, 4  ;;  %s1782_s10 = int_to_ptr.vmem [resolvable:$true] %s216_s10 }
  0x10   : > { %p1512_p12 = scmp.ne.s32.totalorder %s2049_s3, %s1511_s13  ;;  %p1518_p5 = scmp.lt.u32.totalorder %s1511_s13, %s2049_s3 }
  0x11   : > { %p1778_p11 = pnand %p1419_p9, %p2053_p1 }
  0x13   : > { %p1513_p13 = pneg %p1778_p11 }
  0x15   : > { %p1514_p0 = pnand %p1513_p13, %p1512_p12 }
  0x17   : > { %p1515_p3 = pneg %p1514_p0 }
  0x19   : > { %p1520_p7 = pnand %p1518_p5, %p1515_p3 }
  0x1b   : > { %1523 = shalt.err (!%p1520_p7)
}
  0x1c   : > { %s1524_s18 = scalar_lea.vmem %s1771_s7, 512  ;;  %p1532_p2 = scmp.lt.s32.totalorder %s1771_s7, %s1771_s7 }
  0x1d   : > { %p1525_p9 = scmp.ne.s32.totalorder %s1771_s7, %s1524_s18  ;;  %p1533_p12 = scmp.lt.s32.totalorder %s1524_s18, %s1524_s18 }
  0x1f   : > { %p1527_p10 = pnand %p1525_p9, %p1513_p13  ;;  %p1534_p0 = por %p1533_p12, %p1532_p2 }
  0x21   : > { %p1528_p1 = pneg %p1527_p10 }
  0x23   : > { %p1535_p6 = pnand %p1534_p0, %p1528_p1 }
  0x25   : > { %1538 = shalt.err (!%p1535_p6)
}
  0x26   : > { %s1671_s19 = smov 128   ;;  %s1672_s20 = smov 8  }
  0x27   : > { %1422 = dma.hbm_to_vmem [thread:$0]  (!%p1778_p11), %s2049_s3, 512, %s1771_s7, [#allocation6], %s1671_s19, %s1671_s19, %s1672_s20  }
  0x28   : > { %s1539_s12 = scalar_lea.hbm %s2050_s4, 512 }
  0x29   : > { %p1540_p2 = scmp.ne.s32.totalorder %s2050_s4, %s1539_s12  ;;  %p1546_p10 = scmp.lt.u32.totalorder %s1539_s12, %s2050_s4 }
  0x2b   : > { %p1542_p1 = pnand %p1540_p2, %p1513_p13 }
  0x2d   : > { %p1543_p6 = pneg %p1542_p1 }
  0x2f   : > { %p1548_p3 = pnand %p1546_p10, %p1543_p6 }
  0x31   : > { %1551 = shalt.err (!%p1548_p3)
}
  0x32   : > { %s1552_s7 = scalar_lea.vmem %s1782_s10, 512  ;;  %p1560_p12 = scmp.lt.s32.totalorder %s1782_s10, %s1782_s10 }
  0x33   : > { %p1553_p5 = scmp.ne.s32.totalorder %s1782_s10, %s1552_s7  ;;  %p1561_p0 = scmp.lt.s32.totalorder %s1552_s7, %s1552_s7 }
  0x35   : > { %p1555_p7 = pnand %p1553_p5, %p1513_p13  ;;  %p1562_p2 = por %p1561_p0, %p1560_p12 }
  0x37   : > { %p1556_p9 = pneg %p1555_p7 }
  0x39   : > { %p1563_p1 = pnand %p1562_p2, %p1556_p9 }
  0x3b   : > { %1566 = shalt.err (!%p1563_p1)
}
  0x3c   : > { %1425 = dma.hbm_to_vmem [thread:$0]  (!%p1778_p11), %s2050_s4, 512, %s1782_s10, [#allocation6], %s1671_s19, %s1671_s19, %s1672_s20  }
  0x3d   : > { %s1837_s26 = sadd.s32 1, %s1667_s24   ;;  %s30_s8 = sadd.s32 1, %s1663_s23 }
  0x3e   : > { %s27_s30 = ssub.s32 %s1667_s24, %s1837_s26  ;;  %p37_p13 = scmp.ne.s32.totalorder %s1663_s23, %s1659_s22 }
  0x3f   : > { %p28_p6 = scmp.eq.s32.totalorder %s27_s30, 0  ;;  %p38_p10 = scmp.eq.s32.totalorder %s1667_s24, 0 }
  0x40   : > { %p2060_p3 = scmp.eq.s32.totalorder %s1748_s25, 1  ;;  %p1436_p7 = scmp.lt.s32.totalorder %s1667_s24, 2 }
  0x41   : > { %s1853_s11 = scalar_select %p28_p6, %s1663_s23, %s30_s8  }
  0x42   : > { %p1847_p5 = por %p2060_p3, %p37_p13  ;;  %p39_p9 = por %p38_p10, %p37_p13 }
  0x43   : > { %s233_s12 = sand.u32 1, %s1663_s23   ;;  %s1280_s10 = sshll.u32 %s1667_s24, 7 }
  0x44   : > { %s2061_s9 = scalar_select %p1847_p5, 1, 0 }
  0x45   : > { %s1279_s13 = sshll.u32 %s233_s12, 3  ;;  %s1860_s14 = scalar_lea.hbm %s2046_s0, %s1280_s10 }
  0x46   : > { %s237_s15 = scalar_lea.vmem [#allocation2], %s1279_s13  ;;  %p1864_p11 = pnand %p1436_p7, %p39_p9 }
  0x47   : > { %s244_s16 = sshll.u32 %s237_s15, 4  ;;  %s234_s17 = scalar_lea.sflag [#allocation3], %s233_s12  ;;  %s1862_s16 = int_to_ptr.vmem [resolvable:$true] %s244_s16 }
  0x48   : > { %s1567_s18 = scalar_lea.hbm %s1860_s14, 128  ;;  %p1569_p0 = pneg %p1864_p11 }
  0x49   : > { %p1568_p12 = scmp.ne.s32.totalorder %s1860_s14, %s1567_s18  ;;  %s1572_s13 = scalar_lea.hbm %s2046_s0, 256 }
  0x4a   : > { %p1573_p13 = scmp.lt.u32.totalorder %s1860_s14, %s2046_s0  ;;  %p1574_p6 = scmp.lt.u32.totalorder %s1572_s13, %s1567_s18 }
  0x4b   : > { %p1570_p2 = pnand %p1569_p0, %p1568_p12  ;;  %p1576_p3 = scmp.lt.u32.totalorder %s1567_s18, %s1860_s14 }
  0x4c   : > { %p1575_p10 = por %p1574_p6, %p1573_p13 }
  0x4d   : > { %p1571_p1 = pneg %p1570_p2 }
  0x4e   : > { %p1577_p7 = por %p1576_p3, %p1575_p10 }
  0x50   : > { %p1578_p9 = pnand %p1577_p7, %p1571_p1 }
  0x52   : > { %1581 = shalt.err (!%p1578_p9)
}
  0x53   : > { %s1582_s12 = scalar_lea.vmem %s1862_s16, 128  ;;  %s1673_s20 = smov [#allocation2]  }
  0x54   : > { %p1583_p12 = scmp.ne.s32.totalorder %s1862_s16, %s1582_s12  ;;  %s1587_s15 = sshll.u32 %s1673_s20, 4  ;;  %s1588_s15 = int_to_ptr.vmem [resolvable:$false] %s1587_s15 }
  0x55   : > { %s1589_s8 = scalar_lea.vmem %s1588_s15, 256  ;;  %p1590_p4 = scmp.lt.s32.totalorder %s1862_s16, %s1588_s15 }
  0x56   : > { %p1585_p2 = pnand %p1583_p12, %p1569_p0  ;;  %p1591_p13 = scmp.lt.s32.totalorder %s1589_s8, %s1582_s12 }
  0x58   : > { %p1586_p5 = pneg %p1585_p2  ;;  %p1592_p6 = por %p1591_p13, %p1590_p4 }
  0x5a   : > { %p1593_p10 = pnand %p1592_p6, %p1586_p5 }
  0x5c   : > { %1596 = shalt.err (!%p1593_p10)
}
  0x5d   : > { %1429 = dma.hbm_to_vmem [thread:$0]  (!%p1864_p11), %s1860_s14, 128, %s1862_s16, %s234_s17  }
  0x5e   : > { %253 = sbr.rel (%p1767_p8) target bundleno = 2369 (0x941), region = 44  ;;  %s1896_s18 = sand.u32 (!%p1767_p8), 1, %s1659_s22  }
  0x5f   : > { %s1282_s30 = sshll.u32 (!%p1767_p8), %s1896_s18, 3  ;;  %s256_s13 = scalar_lea.sflag (!%p1767_p8), [#allocation3], %s1896_s18 }
  0x60   : > { %s259_s10 = scalar_lea.vmem (!%p1767_p8), [#allocation2], %s1282_s30  ;;  %p2063_p4 = scmp.ne.s32.totalorder (!%p1767_p8), %s2056_s27, 0 }
  0x65   : > { %1642 = dma.done.wait (%p2063_p4), %s256_s13, 128  }
  0x66   : > { %1644 = vsyncadd (%p2063_p4), %s256_s13, 4294967168  ;;  %p2064_p5 = scmp.eq.s32.totalorder %s1748_s25, 0 }
  0x68   : > { %1646 = dma.done.wait (%p2064_p5), [#allocation6], 1024   ;;  %p2065_p8 = pmov %p2064_p5 }
  0x69   : > { %vm297_vm0 = vcmask 261120   ;;  %v1910_v0 = vld [vmem:[%s259_s10] sm:$0xff]  ;;  %v328_v7 = vld [vmem:[#allocation5] sm:$0xff]  ;;  %v329_v8 = vld [vmem:[#allocation5 + $0x8] sm:$0xff]  ;;  %v1674_v10 = vmov 0.0|0.0   ;;  %vm1675_vm1 = vmmov 0  }
  0x6a   : > { %1648 = vsyncadd (%p2065_p8), [#allocation6], 4294966272  ;;  %v298_v1 = vsel %vm297_vm0, %v1910_v0, 0.0  ;;  %v330_v9 = vld [vmem:[#allocation5 + $0x10] sm:$0xff]  ;;  %1395 = vmatprep.subr.bf16.mxu0 %v1674_v10  ;;  %v1396_v11 = vpack.c.bf16 %v329_v8, %v328_v7  ;;  %v331_v12 = vld [vmem:[#allocation5 + $0x18] sm:$0xff]  ;;  %v1676_v13 = vmov 0.0  }
  0x6b   : > { %299 = vadd.xlane.f32.xlu0 %v298_v1  ;;  %1341 = vmatprep.mubr.msk.f32.mxu0 %vm1675_vm1, %v1676_v13  ;;  %v1399_v14 = vpack.c.bf16 %v331_v12, %v330_v9  ;;  %v1286_v19 = vld [vmem:[%s2047_s1] ss:$0 sm:$0xff]  ;;  %s1677_s7 = smov 64   ;;  %s1678_s17 = smov 96   ;;  %vm409_vm2 = vcmask 64512   ;;  %vm1080_vm3 = vcmask 130048  }
  0x6c   : > { %1344 = vmatprep.subr.mxu1 %v1676_v13  ;;  %1346 = vmatprep.mubr.msk.f32.mxu1 %vm1675_vm1, %v1676_v13  ;;  %v1287_v21 = vld [vmem:[%s2048_s2] ss:$0 sm:$0xff]  ;;  %s1679_s19 = smov 88   ;;  %s1680_s12 = smov 120   ;;  %vm1082_vm4 = vcmask 195584  }
  0x6d   : > { %1397 = vmatpush3.bf16.msra.mxu0 %v1396_v11  ;;  %s1681_s20 = smov 80   ;;  %s1682_s15 = smov 112  }
  0x6e   : > { %1398 = vmatprep.subr.bf16.mxu0 %v1674_v10  ;;  %s1683_s8 = smov 72   ;;  %s1684_s13 = smov 104  }
  0x6f   : > { %s1685_s10 = smov 48   ;;  %s1686_s27 = smov 56  }
  0x70   : > { %s1687_s29 = smov 40   ;;  %s1688_s14 = smov 8  }
  0x71   : > { %1400 = vmatpush3.bf16.msra.mxu0 %v1399_v14  ;;  %s1689_s16 = smov 16   ;;  %p2066_p0 = scmp.ne.s32.totalorder %s2061_s9, 0 }
  0x72   : > { %1364 = vmatprep.subr.mxu0 %v1676_v13 }
  0xf8   : > { %v300_v2 = vpop.xlane.xlu0 %299 }
  0xf9   : > { %v302_v3 = vmul.f32 0.03125, %v300_v2 }
  0xfb   : > { %v303_v4 = vsub.f32 %v1910_v0, %v302_v3 }
  0xfd   : > { %v304_v5 = vmul.f32 %v303_v4, %v303_v4 }
  0xff   : > { %v305_v6 = vsel %vm297_vm0, %v304_v5, 0.0 }
 0x100   : > { %306 = vadd.xlane.f32.xlu0 %v305_v6 }
 0x18d   : > { %v307_v15 = vpop.xlane.xlu0 %306 }
 0x18e   : > { %v308_v16 = vmul.f32 0.03125, %v307_v15 }
 0x190   : > { %v309_v17 = vadd.f32 1e-05, %v308_v16 }
 0x192   : > { %1493 = vrsqrt.f32 %v309_v17 }
 0x19c   : > { %v1494_v18 = vpop.eup %1493 }
 0x19d   : > { %v311_v20 = vmul.f32 %v1494_v18, %v303_v4 }
 0x19f   : > { %v319_v22 = vmul.f32 %v1286_v19, %v311_v20 }
 0x1a1   : > { %v327_v23 = vadd.f32 %v1287_v21, %v319_v22 }
 0x1a3   : > { %1342 = vmatmul.mubr.msk.f32.vlgmr.msra.gmra.mrb[0].mxu0 %vm297_vm0, %v327_v23  ;;  %v1092_v23 = vld [vmem:[#allocation7] sm:$0xff] }
 0x1a4   : > { %1366 = vmatprep.mubr.msk.f32.mxu0 %vm1675_vm1, %v1676_v13 }
 0x276   : > { %v1933_v24 = vpop.f32.mrb[0].mxu0 }
 0x277   : > { %496 = vrot.lane.b32.xlu0 %v1933_v24, %s1677_s7  ;;  %407 = vrot.lane.b32.xlu1 %v1933_v24, %s1678_s17  ;;  %v1343_v25 = vpop.f32.mrb[1].mxu0  ;;  %v405_v26 = vmul.f32 0.17677669, %v1933_v24  ;;  %s1690_s7 = smov 24  }
 0x27b   : > { %574 = vrot.lane.b32.xlu0 %v1933_v24, %s1679_s19 }
 0x27f   : > { %572 = vrot.lane.b32.xlu0 %v405_v26, %s1680_s12  ;;  %s1304_s12 = sshll.u32 %s1748_s25, 7 }
 0x2e9   : > { %v408_v27 = vpop.permute.xlu1 %407  ;;  %v497_v28 = vpop.permute.xlu0 %496 }
 0x2ea   : > { %1345 = vmatpush3.xpose.msk.msra.mxu1 %vm409_vm2, %v408_v27  ;;  %v1095_v27 = vld [vmem:[#allocation7 + $0x18] sm:$0xff] }
 0x2eb   : > { %1349 = vmatprep.subr.mxu1 %v1676_v13 }
 0x2ed   : > { %1347 = vmatmul.mubr.msk.f32.vlgmr.msra.gmra.mrb[0].mxu1 %vm409_vm2, %v405_v26  ;;  %v575_v38 = vpop.permute.xlu0 %574 }
 0x2ee   : > { %1350 = vmatpush3.msra.mxu1 %v497_v28  ;;  %1351 = vmatprep.mubr.msk.f32.mxu1 %vm1675_vm1, %v1676_v13 }
 0x2ef   : > { %1354 = vmatprep.subr.mxu1 %v1676_v13 }
 0x2f1   : > { %v573_v39 = vpop.permute.xlu0 %572 }
 0x3c0   : > { %v481_v29 = vpop.f32.mrb[0].mxu1 }
 0x3c1   : > { %v1348_v30 = vpop.f32.mrb[1].mxu1  ;;  %v485_v31 = vsel %vm409_vm2, %v481_v29, -inf }
 0x3c2   : > { %486 = vmax.xlane.f32.xlu1 %v485_v31 }
 0x3d3   : > { %739 = vrot.lane.b32.xlu1 %v1933_v24, %s1681_s20  ;;  %s295_s20 = scalar_lea.vmem [#allocation8], %s1282_s30  ;;  %s1691_s30 = smov [#allocation8]  }
 0x44f   : > { %v487_v32 = vpop.xlane.xlu1 %486 }
 0x450   : > { %v488_v33 = vsub.f32 %v481_v29, %v487_v32 }
 0x452   : > { %v489_v34 = vmul.f32 1.442695, %v488_v33 }
 0x453   : > { %v740_v35 = vpop.permute.xlu1 %739 }
 0x454   : > { %1495 = vpow2.f32 %v489_v34  ;;  %1365 = vmatpush3.xpose.msk.msra.mxu0 %vm409_vm2, %v740_v35 }
 0x455   : > { %1374 = vmatprep.subr.mxu0 %v1676_v13 }
 0x45e   : > { %v1496_v36 = vpop.eup %1495 }
 0x45f   : > { %v491_v37 = vsel %vm409_vm2, %v1496_v36, 0.0 }
 0x460   : > { %492 = vadd.xlane.f32.xlu0 %v491_v37 }
 0x476   : > { %737 = vrot.lane.b32.xlu0 %v405_v26, %s1682_s15  ;;  %s1185_s15 = sshll.u32 %s295_s20, 4  ;;  %s2003_s15 = int_to_ptr.vmem [resolvable:$true] %s1185_s15 }
 0x477   : > { %s1597_s25 = scalar_lea.vmem %s2003_s15, 128 }
 0x478   : > { %p1598_p11 = scmp.ne.s32.totalorder %s2003_s15, %s1597_s25 }
 0x47a   : > { %904 = vrot.lane.b32.xlu0 %v1933_v24, %s1683_s8  ;;  %p1599_p1 = pnand %p1598_p11, %p2066_p0 }
 0x47c   : > { %p1600_p3 = pneg %p1599_p1 }
 0x47e   : > { %902 = vrot.lane.b32.xlu0 %v405_v26, %s1684_s13  ;;  %v1094_v26 = vld [vmem:[#allocation7 + $0x10] sm:$0xff] }
 0x47f   : > { %v1405_v28 = vpack.c.bf16 %v1095_v27, %v1094_v26 }
 0x4ed   : > { %v493_v40 = vpop.xlane.xlu0 %492 }
 0x4ee   : > { %1497 = vrcp.f32 %v493_v40 }
 0x4f1   : > { %v738_v41 = vpop.permute.xlu0 %737 }
 0x4f2   : > { %1367 = vmatmul.mubr.msk.f32.vlgmr.msra.gmra.mrb[2].mxu0 %vm409_vm2, %v738_v41 }
 0x4f3   : > { %1376 = vmatprep.mubr.msk.f32.mxu0 %vm1675_vm1, %v1676_v13 }
 0x4f5   : > { %v905_v42 = vpop.permute.xlu0 %904 }
 0x4f6   : > { %1375 = vmatpush3.xpose.msk.msra.mxu0 %vm409_vm2, %v905_v42 }
 0x4f7   : > { %1401 = vmatprep.subr.bf16.mxu0 %v1674_v10 }
 0x4f8   : > { %v1498_v43 = vpop.eup %1497 }
 0x4f9   : > { %v495_v44 = vmul.f32 %v1498_v43, %v1496_v36  ;;  %v903_v45 = vpop.permute.xlu0 %902 }
 0x4fa   : > { %1377 = vmatmul.mubr.msk.f32.vlgmr.msra.gmra.mrb[4].mxu0 %vm409_vm2, %v903_v45 }
 0x4fb   : > { %1352 = vmatmul.mubr.msk.f32.vlgmr.msra.gmra.mrb[2].mxu1 %vm409_vm2, %v495_v44  ;;  %1392 = vmatprep.mubr.msk.f32.mxu0 %vm1675_vm1, %v1676_v13 }
 0x4fc   : > { %1355 = vmatpush3.xpose.msk.msra.mxu1 %vm409_vm2, %v575_v38  ;;  %1356 = vmatprep.mubr.msk.f32.mxu1 %vm1675_vm1, %v1676_v13 }
 0x4fd   : > { %1359 = vmatprep.subr.mxu1 %v1676_v13 }
 0x4ff   : > { %1357 = vmatmul.mubr.msk.f32.vlgmr.msra.gmra.mrb[4].mxu1 %vm409_vm2, %v573_v39  ;;  %v1301_v39 = vld [vmem:[%s2051_s5] ss:$0 sm:$0xff] }
 0x500   : > { %1361 = vmatprep.mubr.msk.f32.mxu1 %vm1675_vm1, %v1676_v13  ;;  %v1091_v40 = vadd.f32 %v1301_v39, %v1910_v0 }
 0x5c5   : > { %v811_v46 = vpop.f32.mrb[2].mxu0 }
 0x5c6   : > { %v1368_v47 = vpop.f32.mrb[3].mxu0  ;;  %v815_v48 = vsel %vm409_vm2, %v811_v46, -inf }
 0x5c7   : > { %816 = vmax.xlane.f32.xlu1 %v815_v48 }
 0x5cd   : > { %v976_v49 = vpop.f32.mrb[4].mxu0 }
 0x5ce   : > { %v1968_v50 = vpop.f32.mrb[2].mxu1  ;;  %v1378_v51 = vpop.f32.mrb[5].mxu0  ;;  %v980_v56 = vsel %vm409_vm2, %v976_v49, -inf }
 0x5cf   : > { %v1353_v52 = vpop.f32.mrb[3].mxu1 }
 0x5d2   : > { %v646_v53 = vpop.f32.mrb[4].mxu1 }
 0x5d3   : > { %v1358_v54 = vpop.f32.mrb[5].mxu1  ;;  %v650_v55 = vsel %vm409_vm2, %v646_v53, -inf }
 0x5d4   : > { %651 = vmax.xlane.f32.xlu0 %v650_v55 }
 0x5d8   : > { %981 = vmax.xlane.f32.xlu0 %v980_v56 }
 0x654   : > { %v817_v57 = vpop.xlane.xlu1 %816 }
 0x655   : > { %v818_v58 = vsub.f32 %v811_v46, %v817_v57 }
 0x657   : > { %v819_v59 = vmul.f32 1.442695, %v818_v58 }
 0x659   : > { %1499 = vpow2.f32 %v819_v59 }
 0x661   : > { %v652_v60 = vpop.xlane.xlu0 %651 }
 0x662   : > { %v653_v61 = vsub.f32 %v646_v53, %v652_v60 }
 0x663   : > { %v1500_v62 = vpop.eup %1499 }
 0x664   : > { %v654_v63 = vmul.f32 1.442695, %v653_v61  ;;  %v821_v1 = vsel %vm409_vm2, %v1500_v62, 0.0 }
 0x665   : > { %822 = vadd.xlane.f32.xlu0 %v821_v1  ;;  %v982_v2 = vpop.xlane.xlu0 %981 }
 0x666   : > { %1501 = vpow2.f32 %v654_v63  ;;  %v983_v3 = vsub.f32 %v976_v49, %v982_v2 }
 0x668   : > { %v984_v4 = vmul.f32 1.442695, %v983_v3 }
 0x66a   : > { %1503 = vpow2.f32 %v984_v4 }
 0x670   : > { %v1502_v5 = vpop.eup %1501 }
 0x671   : > { %v656_v6 = vsel %vm409_vm2, %v1502_v5, 0.0 }
 0x672   : > { %657 = vadd.xlane.f32.xlu0 %v656_v6 }
 0x674   : > { %v1504_v7 = vpop.eup %1503 }
 0x675   : > { %v986_v8 = vsel %vm409_vm2, %v1504_v7, 0.0 }
 0x676   : > { %987 = vadd.xlane.f32.xlu1 %v986_v8 }
 0x687   : > { %826 = vrot.lane.b32.xlu1 %v1933_v24, %s1685_s10  ;;  %s2001_s10 = scalar_lea.hbm %s2052_s6, %s1304_s12 }
 0x688   : > { %661 = vrot.lane.b32.xlu0 %v1933_v24, %s1686_s27  ;;  %s1172_s27 = scalar_lea.sflag [#allocation4], %s1896_s18 }
 0x68b   : > { %991 = vrot.lane.b32.xlu1 %v1933_v24, %s1687_s29  ;;  %v1093_v24 = vld [vmem:[#allocation7 + $0x8] sm:$0xff]  ;;  %s1601_s29 = sshll.u32 %s1691_s30, 4  ;;  %s1602_s29 = int_to_ptr.vmem [resolvable:$false] %s1601_s29 }
 0x68c   : > { %v1402_v25 = vpack.c.bf16 %v1093_v24, %v1092_v23  ;;  %p1604_p7 = scmp.lt.s32.totalorder %s2003_s15, %s1602_s29 }
 0x68e   : > { %1403 = vmatpush3.bf16.msra.mxu0 %v1402_v25 }
 0x68f   : > { %1404 = vmatprep.subr.bf16.mxu0 %v1674_v10 }
 0x692   : > { %1406 = vmatpush3.bf16.msra.mxu0 %v1405_v28 }
 0x6f2   : > { %v823_v9 = vpop.xlane.xlu0 %822 }
 0x6ff   : > { %v658_v11 = vpop.xlane.xlu0 %657 }
 0x700   : > { %1505 = vrcp.f32 %v658_v11 }
 0x701   : > { %1507 = vrcp.f32 %v823_v9 }
 0x703   : > { %v988_v12 = vpop.xlane.xlu1 %987  ;;  %v662_v14 = vpop.permute.xlu0 %661 }
 0x704   : > { %1360 = vmatpush3.msra.mxu1 %v662_v14  ;;  %1509 = vrcp.f32 %v988_v12 }
 0x705   : > { %1369 = vmatprep.subr.mxu1 %v1676_v13 }
 0x707   : > { %v827_v17 = vpop.permute.xlu1 %826 }
 0x70a   : > { %v1506_v15 = vpop.eup %1505 }
 0x70b   : > { %v660_v16 = vmul.f32 %v1506_v15, %v1502_v5  ;;  %v1508_v18 = vpop.eup %1507  ;;  %v992_v21 = vpop.permute.xlu1 %991 }
 0x70c   : > { %v825_v19 = vmul.f32 %v1508_v18, %v1500_v62 }
 0x70d   : > { %1362 = vmatmul.mubr.msk.f32.vlgmr.msra.gmra.mrb[6].mxu1 %vm409_vm2, %v660_v16 }
 0x70e   : > { %1370 = vmatpush3.msra.mxu1 %v827_v17  ;;  %1371 = vmatprep.mubr.msk.f32.mxu1 %vm1675_vm1, %v1676_v13  ;;  %v1510_v20 = vpop.eup %1509 }
 0x70f   : > { %1379 = vmatprep.subr.mxu1 %v1676_v13  ;;  %v990_v22 = vmul.f32 %v1510_v20, %v1504_v7 }
 0x711   : > { %1372 = vmatmul.mubr.msk.f32.vlgmr.msra.gmra.mrb[8].mxu1 %vm409_vm2, %v825_v19 }
 0x712   : > { %1380 = vmatpush3.msra.mxu1 %v992_v21  ;;  %1381 = vmatprep.mubr.msk.f32.mxu1 %vm1675_vm1, %v1676_v13 }
 0x715   : > { %1382 = vmatmul.mubr.msk.f32.vlgmr.msra.gmra.mrb[10].mxu1 %vm409_vm2, %v990_v22 }
 0x7e0   : > { %v733_v29 = vpop.f32.mrb[6].mxu1 }
 0x7e1   : > { %1068 = vrot.lane.b32.xlu1 %v733_v29, %s1688_s14  ;;  %v1363_v30 = vpop.f32.mrb[7].mxu1  ;;  %s1603_s14 = scalar_lea.vmem %s1602_s29, 256 }
 0x7e2   : > { %p1605_p9 = scmp.lt.s32.totalorder %s1603_s14, %s1597_s25 }
 0x7e4   : > { %v898_v31 = vpop.f32.mrb[8].mxu1  ;;  %p1606_p12 = por %p1605_p9, %p1604_p7 }
 0x7e5   : > { %1072 = vrot.lane.b32.xlu0 %v898_v31, %s1689_s16  ;;  %v1373_v13 = vpop.f32.mrb[9].mxu1 }
 0x7e6   : > { %p1607_p2 = pnand %p1606_p12, %p1600_p3 }
 0x7e8   : > { %v1063_v32 = vpop.f32.mrb[10].mxu1 }
 0x7e9   : > { %1076 = vrot.lane.b32.xlu1 %v1063_v32, %s1690_s7  ;;  %v1383_v33 = vpop.f32.mrb[11].mxu1 }
 0x853   : > { %v1069_v34 = vpop.permute.xlu1 %1068 }
 0x854   : > { %v1079_v35 = vsel %vm409_vm2, %v1968_v50, %v1069_v34 }
 0x857   : > { %v1073_v10 = vpop.permute.xlu0 %1072 }
 0x858   : > { %v1081_v36 = vsel %vm1080_vm3, %v1079_v35, %v1073_v10 }
 0x85b   : > { %v1077_v37 = vpop.permute.xlu1 %1076 }
 0x85c   : > { %v1083_v38 = vsel %vm1082_vm4, %v1081_v36, %v1077_v37 }
 0x85d   : > { %1393 = vmatmul.mubr.msk.f32.vlgmr.msra.gmra.mrb[6].mxu0 %vm297_vm0, %v1083_v38 }
 0x930   : > { %v1165_v41 = vpop.f32.mrb[6].mxu0 }
 0x931   : > { %v1169_v42 = vadd.f32 %v1165_v41, %v1091_v40  ;;  %v1394_v43 = vpop.f32.mrb[7].mxu0 }
 0x933   : > { %1170 = vst.msk [vmem:[%s295_s20] sm:$0xff] %vm297_vm0, %v1169_v42 }
 0x934   : > { %1610 = shalt.err (!%p1607_p2)
}
 0x935   : > { %s1611_s18 = scalar_lea.hbm %s2001_s10, 128  ;;  %s1615_s17 = scalar_lea.hbm %s2052_s6, 256 }
 0x936   : > { %p1612_p13 = scmp.ne.s32.totalorder %s2001_s10, %s1611_s18  ;;  %p1616_p4 = scmp.lt.u32.totalorder %s2001_s10, %s2052_s6 }
 0x937   : > { %p1617_p5 = scmp.lt.u32.totalorder %s1615_s17, %s1611_s18  ;;  %p1619_p11 = scmp.lt.u32.totalorder %s1611_s18, %s2001_s10 }
 0x938   : > { %p1613_p6 = pnand %p1612_p13, %p2066_p0 }
 0x939   : > { %p1618_p8 = por %p1617_p5, %p1616_p4 }
 0x93a   : > { %p1614_p10 = pneg %p1613_p6 }
 0x93b   : > { %p1620_p1 = por %p1619_p11, %p1618_p8 }
 0x93d   : > { %p1621_p3 = pnand %p1620_p1, %p1614_p10 }
 0x93f   : > { %1624 = shalt.err (!%p1621_p3)
}
 0x940   : > { %1417 = dma.vmem_to_hbm [thread:$0]  (%p2066_p0), %s2003_s15, 128, %s2001_s10, %s1172_s27  }
 0x941 PF: > { %s1197_s20 = sand.u32 1, %s1655_s21   ;;  %p2067_p7 = scmp.ne.s32.totalorder %s2057_s28, 0 }
 0x942   : > { %p2068_p9 = scmp.ge.s32.totalorder %s1667_s24, 2  ;;  %s1198_s8 = scalar_lea.sflag [#allocation4], %s1197_s20 }
 0x944   : > { %p1431_p12 = pnand %p2068_p9, %p2067_p7 }
 0x946   : > { %1650 = dma.done.wait (!%p1431_p12), %s1198_s8, 128  }
 0x947   : > { %1652 = vsyncadd (!%p1431_p12), %s1198_s8, 4294967168  ;;  %p20_p2 = scmp.ge.s32.totalorder %s1837_s26, 4   ;;  %s2069_s21 = smov %s1659_s22 }
 0x948   : > { %s2070_s22 = smov %s1663_s23  ;;  %s2071_s23 = smov %s1853_s11 }
 0x949   : > { %s2072_s24 = smov %s1837_s26  ;;  %22 = sbr.rel (!%p20_p2) target bundleno = 6 (0x6), region = 97 }
 0x950   :  { %1203 = vsyncpa [#allocation3], 1 }
 0x951   :  { %1205 = vsyncpa [#allocation3 + $0x1], 1 }
 0x952   :  { %1206 = vsyncpa [#allocation6], 1 }
 0x953   :  { %1207 = vsyncpa [#allocation4], 1 }
 0x954   :  { %1209 = vsyncpa [#allocation4 + $0x1], 1 }

</bundles_post_ra>
